<compile_context>
chip_gen: v5e
topology: v5e:2x2
jax: 0.10.0
libtpu: 0.0.40
codegen_flags: <defaults>
</compile_context>

<pallas_src>
import functools

import jax
import jax.numpy as jnp
from jax.experimental import pallas as pl
from jax.experimental.pallas import tpu as pltpu

TM = 128                      # target-node row tile
FIN_PAD = 128                 # lane-pad the raw 5 spectral features to 128
_VMEM_LIMIT = 32 * 1024 * 1024  # explicit, safe on v5e/v6e/v7x


def _round_up(x, m):
    return (x + m - 1) // m * m


# ----------------------------- Pallas kernels -----------------------------

def gat_prep_kernel(x_ref, w_ref, ssrc_ref, sdst_ref, z_ref, src_ref, dst_ref):
    """Row tile: Z = X @ W once, plus per-head attention scores as block-diag matmuls."""
    z = jnp.dot(x_ref[...], w_ref[...], preferred_element_type=jnp.float32)
    z_ref[...] = z
    src_ref[...] = jnp.dot(z, ssrc_ref[...], preferred_element_type=jnp.float32)
    dst_ref[...] = jnp.dot(z, sdst_ref[...], preferred_element_type=jnp.float32)


def gat_prop_kernel(mask_ref, dst_ref, srct_ref, z_ref, b_ref, o_ref, *, heads, f_out):
    """Target-row tile: masked per-head softmax attention, aggregation, bias, ELU."""
    m = mask_ref[...]            # (TM, N) bf16 0/1 adjacency (+ self loops), streamed
    dst = dst_ref[...]           # (TM, H) target scores for this tile
    z = z_ref[...]               # (N, H*F) transformed features, VMEM-resident
    outs = []
    for h in range(heads):       # static unroll, H = 8
        e = dst[:, h:h + 1] + srct_ref[h:h + 1, :]          # (TM, N)
        e = jnp.where(e > 0, e, 0.2 * e)                    # LeakyReLU(0.2)
        e = jnp.where(m > 0, e, -1e30)                      # mask non-edges
        e = e - jnp.max(e, axis=-1, keepdims=True)
        p = jnp.exp(e)
        p = jnp.where(m > 0, p, 0.0)
        denom = jnp.sum(p, axis=-1, keepdims=True)
        alpha = p * pl.reciprocal(denom, approx=True)       # EUP, off the VALU slot
        outs.append(jnp.dot(alpha, z[:, h * f_out:(h + 1) * f_out],
                            preferred_element_type=jnp.float32))
    out = jnp.concatenate(outs, axis=-1) + b_ref[...]
    o_ref[...] = jnp.where(out > 0, out, jnp.exp(out) - 1.0)  # ELU


def head_kernel(p_ref, h_ref, w1_ref, b1_ref, w2_ref, b2_ref, o_ref):
    """global_mean_pool (as pool-matrix matmul) + relu(fc1) + fc2 — one tiny call."""
    pooled = jnp.dot(p_ref[...], h_ref[...], preferred_element_type=jnp.float32)
    zz = jnp.dot(pooled, w1_ref[...], preferred_element_type=jnp.float32) + b1_ref[...]
    zz = jnp.maximum(zz, 0.0)
    o_ref[...] = jnp.dot(zz, w2_ref[...], preferred_element_type=jnp.float32) + b2_ref[...]


# ----------------------------- wrappers ------------------------------------

def _blockdiag_att(a):
    """(heads, f_out) attention vector -> (heads*f_out, heads) block-diagonal matrix so
    per-head score reduction is a single MXU matmul Z @ S (no in-kernel reshapes)."""
    h, f = a.shape
    rows = jnp.arange(h * f)
    return jnp.zeros((h * f, h), jnp.float32).at[rows, rows // f].set(a.reshape(-1))


def gat_layer(mask, x, w, a_src, a_dst, b, *, heads, f_out, tm=TM):
    n_pad, f_in = x.shape
    hf = heads * f_out
    assert n_pad % tm == 0
    grid = (n_pad // tm,)
    s_src = _blockdiag_att(a_src)
    s_dst = _blockdiag_att(a_dst)

    # Stage 1: Z = X @ W and per-head scores, row-tiled, computed exactly once.
    z, src_sc, dst_sc = pl.pallas_call(
        gat_prep_kernel,
        out_shape=(jax.ShapeDtypeStruct((n_pad, hf), jnp.float32),
                   jax.ShapeDtypeStruct((n_pad, heads), jnp.float32),
                   jax.ShapeDtypeStruct((n_pad, heads), jnp.float32)),
        grid=grid,
        in_specs=[pl.BlockSpec((tm, f_in), lambda i: (i, 0)),
                  pl.BlockSpec((f_in, hf), lambda i: (0, 0)),
                  pl.BlockSpec((hf, heads), lambda i: (0, 0)),
                  pl.BlockSpec((hf, heads), lambda i: (0, 0))],
        out_specs=[pl.BlockSpec((tm, hf), lambda i: (i, 0)),
                   pl.BlockSpec((tm, heads), lambda i: (i, 0)),
                   pl.BlockSpec((tm, heads), lambda i: (i, 0))],
        compiler_params=pltpu.CompilerParams(
            dimension_semantics=("parallel",), vmem_limit_bytes=_VMEM_LIMIT),
    )(x, w, s_src, s_dst)

    src_t = src_sc.T  # (heads, n_pad): source scores laid out lane-dense for the kernel

    # Stage 2: stream (TM, N) mask tiles, attention + aggregation, Z/scores VMEM-resident.
    prop = functools.partial(gat_prop_kernel, heads=heads, f_out=f_out)
    out = pl.pallas_call(
        prop,
        out_shape=jax.ShapeDtypeStruct((n_pad, hf), jnp.float32),
        grid=grid,
        in_specs=[pl.BlockSpec((tm, n_pad), lambda i: (i, 0)),     # mask row tile (bf16)
                  pl.BlockSpec((tm, heads), lambda i: (i, 0)),     # dst scores (tile)
                  pl.BlockSpec((heads, n_pad), lambda i: (0, 0)),  # src scores (resident)
                  pl.BlockSpec((n_pad, hf), lambda i: (0, 0)),     # Z (resident)
                  pl.BlockSpec((1, hf), lambda i: (0, 0))],        # bias
        out_specs=pl.BlockSpec((tm, hf), lambda i: (i, 0)),
        compiler_params=pltpu.CompilerParams(
            dimension_semantics=("parallel",), vmem_limit_bytes=_VMEM_LIMIT),
    )(mask, dst_sc, src_t, z, b.reshape(1, hf))
    return out


def mlp_head(pool_mat, h, w1, b1, w2, b2):
    g, n = pool_mat.shape
    f = h.shape[1]
    h1 = w1.shape[1]
    h2 = w2.shape[1]
    full = lambda s: pl.BlockSpec(s, lambda i: (0,) * len(s))
    return pl.pallas_call(
        head_kernel,
        out_shape=jax.ShapeDtypeStruct((g, h2), jnp.float32),
        grid=(1,),
        in_specs=[full((g, n)), full((n, f)), full((f, h1)), full((1, h1)),
                  full((h1, h2)), full((1, h2))],
        out_specs=full((g, h2)),
        compiler_params=pltpu.CompilerParams(
            dimension_semantics=("arbitrary",), vmem_limit_bytes=_VMEM_LIMIT),
    )(pool_mat, h, w1, b1.reshape(1, h1), w2, b2.reshape(1, h2))


# ----------------------------- plain-JAX glue -------------------------------
# TODO(synk): for real sparse graphs, replace the dense (N,N) mask with a block-sparse /
# scalar-prefetched neighbor-block formulation (PrefetchScalarGridSpec) to go O(E).

def dense_mask(edge_index, n_pad):
    """M[i, j] = 1 iff edge (j -> i) exists or i == j (self loops, also on pad rows)."""
    src, dst = edge_index[0], edge_index[1]
    m = jnp.zeros((n_pad, n_pad), jnp.float32)
    m = m.at[dst, src].set(1.0)
    m = jnp.maximum(m, jnp.eye(n_pad, dtype=jnp.float32))
    return m.astype(jnp.bfloat16)   # 0/1 exact in bf16, halves the O(N^2) HBM traffic


def mean_pool_matrix(batch, num_graphs, n_pad):
    n = batch.shape[0]
    batch_pad = jnp.concatenate(
        [batch, jnp.full((n_pad - n,), num_graphs, jnp.int32)])   # pads -> no graph
    onehot = (batch_pad[None, :] == jnp.arange(num_graphs)[:, None]).astype(jnp.float32)
    counts = jnp.maximum(jnp.sum(onehot, axis=1, keepdims=True), 1.0)
    return onehot / counts


def glorot(key, shape):
    fan_in, fan_out = shape[-2], shape[-1]
    limit = jnp.sqrt(6.0 / (fan_in + fan_out))
    return jax.random.uniform(key, shape, jnp.float32, -limit, limit)


def init_params(key, num_features, f_in_pad):
    ks = jax.random.split(key, 11)

    def conv(kw, ka, kd, f_in, heads, f_out, pad_to=None):
        w = glorot(kw, (f_in, heads * f_out))
        if pad_to is not None and pad_to > f_in:
            w = jnp.pad(w, ((0, pad_to - f_in), (0, 0)))   # zero rows for padded lanes
        return {"w": w,
                "a_src": glorot(ka, (heads, f_out)),
                "a_dst": glorot(kd, (heads, f_out)),
                "b": jnp.zeros((heads * f_out,), jnp.float32)}

    return {
        "conv1": conv(ks[0], ks[1], ks[2], num_features, 8, 8, pad_to=f_in_pad),
        "conv2": conv(ks[3], ks[4], ks[5], 64, 8, 16),
        "conv3": conv(ks[6], ks[7], ks[8], 128, 8, 16),
        "fc1_w": glorot(ks[9], (128, 32)),
        "fc1_b": jnp.zeros((32,), jnp.float32),
        "fc2_w": glorot(ks[10], (32, 1)),
        "fc2_b": jnp.zeros((1,), jnp.float32),
    }


def gat_net_forward(params, x, mask, pool_mat):
    # F.dropout(p=0.2, training=False) == identity.
    h = gat_layer(mask, x, params["conv1"]["w"], params["conv1"]["a_src"],
                  params["conv1"]["a_dst"], params["conv1"]["b"], heads=8, f_out=8)
    h = gat_layer(mask, h, params["conv2"]["w"], params["conv2"]["a_src"],
                  params["conv2"]["a_dst"], params["conv2"]["b"], heads=8, f_out=16)
    h = gat_layer(mask, h, params["conv3"]["w"], params["conv3"]["a_src"],
                  params["conv3"]["a_dst"], params["conv3"]["b"], heads=8, f_out=16)
    return mlp_head(pool_mat, h, params["fc1_w"], params["fc1_b"],
                    params["fc2_w"], params["fc2_b"])


# ----------------------------- demo ----------------------------------------

if __name__ == "__main__":
    key = jax.random.PRNGKey(0)
    k_x, k_p = jax.random.split(key)

    # Small synthetic batch: 2 ring graphs of 100 nodes each, 5 spectral features/node.
    num_graphs = 2
    nodes_per_graph = 100
    num_nodes = num_graphs * nodes_per_graph            # 200
    num_features = 5                                    # dataset.num_features stand-in
    n_pad = _round_up(num_nodes, TM)                    # 256 -> grid of 2 row tiles

    # node features, zero-padded to (n_pad, FIN_PAD)
    x_raw = jax.random.normal(k_x, (num_nodes, num_features), jnp.float32)
    x = jnp.zeros((n_pad, FIN_PAD), jnp.float32).at[:num_nodes, :num_features].set(x_raw)

    # edge_index: undirected ring within each graph
    src_list, dst_list = [], []
    for g in range(num_graphs):
        base = g * nodes_per_graph
        for i in range(nodes_per_graph):
            j = (i + 1) % nodes_per_graph
            src_list += [base + i, base + j]
            dst_list += [base + j, base + i]
    edge_index = jnp.array([src_list, dst_list], dtype=jnp.int32)

    batch = jnp.repeat(jnp.arange(num_graphs, dtype=jnp.int32), nodes_per_graph)

    mask = dense_mask(edge_index, n_pad)                      # (n_pad, n_pad) bf16
    pool_mat = mean_pool_matrix(batch, num_graphs, n_pad)     # (num_graphs, n_pad)

    params = init_params(k_p, num_features, FIN_PAD)

    out = gat_net_forward(params, x, mask, pool_mat)
    out = jax.block_until_ready(out)
    assert out.shape == (num_graphs, 1) and out.dtype == jnp.float32
    assert bool(jnp.all(jnp.isfinite(out)))
    print("KERNEL_OK")
</pallas_src>

<mosaic_0001>
module attributes {stable_mosaic.version = 11 : i64} {
  func.func @gat_prep_kernel(%arg0: i32, %arg1: memref<128x128xf32, #tpu.memory_space<vmem>>, %arg2: memref<128x64xf32, #tpu.memory_space<vmem>>, %arg3: memref<64x8xf32, #tpu.memory_space<vmem>>, %arg4: memref<64x8xf32, #tpu.memory_space<vmem>>, %arg5: memref<128x64xf32, #tpu.memory_space<vmem>>, %arg6: memref<128x8xf32, #tpu.memory_space<vmem>>, %arg7: memref<128x8xf32, #tpu.memory_space<vmem>>) attributes {dimension_semantics = [#tpu.dimension_semantics<parallel>], iteration_bounds = array<i64: 2>, scalar_prefetch = 0 : i64, scratch_operands = 0 : i64, tpu.core_type = #tpu.core_type<tc>, window_params = [{transform_indices = @transform_0, window_bounds = array<i64: 128, 128>}, {pipeline_mode = #tpu.pipeline_mode<synchronous>, transform_indices = @transform_1, window_bounds = array<i64: 128, 64>}, {pipeline_mode = #tpu.pipeline_mode<synchronous>, transform_indices = @transform_2, window_bounds = array<i64: 64, 8>}, {pipeline_mode = #tpu.pipeline_mode<synchronous>, transform_indices = @transform_3, window_bounds = array<i64: 64, 8>}, {transform_indices = @transform_4, window_bounds = array<i64: 128, 64>}, {transform_indices = @transform_5, window_bounds = array<i64: 128, 8>}, {transform_indices = @transform_6, window_bounds = array<i64: 128, 8>}]} {
    %c0 = arith.constant 0 : index
    %c0_0 = arith.constant 0 : index
    %0 = vector.load %arg1[%c0, %c0_0] : memref<128x128xf32, #tpu.memory_space<vmem>>, vector<128x128xf32>
    %c0_1 = arith.constant 0 : index
    %c0_2 = arith.constant 0 : index
    %1 = vector.load %arg2[%c0_1, %c0_2] : memref<128x64xf32, #tpu.memory_space<vmem>>, vector<128x64xf32>
    %cst = arith.constant dense<0.000000e+00> : vector<128x64xf32>
    %2 = tpu.matmul %0, %1, %cst {dimension_numbers = #tpu.dot_dimension_numbers<[1], [0], [0], [1], [0, 0, 1, 1], [], []>} : vector<128x128xf32>, vector<128x64xf32>, vector<128x64xf32> -> vector<128x64xf32>
    %c0_3 = arith.constant 0 : index
    %c0_4 = arith.constant 0 : index
    %3 = vector.load %arg5[%c0_3, %c0_4] : memref<128x64xf32, #tpu.memory_space<vmem>>, vector<128x64xf32>
    tpu.vector_store %arg5[%c0_3, %c0_4], %2 {strides = array<i32>} : memref<128x64xf32, #tpu.memory_space<vmem>>, vector<128x64xf32>,
    %c0_5 = arith.constant 0 : index
    %c0_6 = arith.constant 0 : index
    %4 = vector.load %arg3[%c0_5, %c0_6] : memref<64x8xf32, #tpu.memory_space<vmem>>, vector<64x8xf32>
    %cst_7 = arith.constant dense<0.000000e+00> : vector<128x8xf32>
    %5 = tpu.matmul %2, %4, %cst_7 {dimension_numbers = #tpu.dot_dimension_numbers<[1], [0], [0], [1], [0, 0, 1, 1], [], []>} : vector<128x64xf32>, vector<64x8xf32>, vector<128x8xf32> -> vector<128x8xf32>
    %c0_8 = arith.constant 0 : index
    %c0_9 = arith.constant 0 : index
    %6 = vector.load %arg6[%c0_8, %c0_9] : memref<128x8xf32, #tpu.memory_space<vmem>>, vector<128x8xf32>
    tpu.vector_store %arg6[%c0_8, %c0_9], %5 {strides = array<i32>} : memref<128x8xf32, #tpu.memory_space<vmem>>, vector<128x8xf32>,
    %c0_10 = arith.constant 0 : index
    %c0_11 = arith.constant 0 : index
    %7 = vector.load %arg4[%c0_10, %c0_11] : memref<64x8xf32, #tpu.memory_space<vmem>>, vector<64x8xf32>
    %cst_12 = arith.constant dense<0.000000e+00> : vector<128x8xf32>
    %8 = tpu.matmul %2, %7, %cst_12 {dimension_numbers = #tpu.dot_dimension_numbers<[1], [0], [0], [1], [0, 0, 1, 1], [], []>} : vector<128x64xf32>, vector<64x8xf32>, vector<128x8xf32> -> vector<128x8xf32>
    %c0_13 = arith.constant 0 : index
    %c0_14 = arith.constant 0 : index
    %9 = vector.load %arg7[%c0_13, %c0_14] : memref<128x8xf32, #tpu.memory_space<vmem>>, vector<128x8xf32>
    tpu.vector_store %arg7[%c0_13, %c0_14], %8 {strides = array<i32>} : memref<128x8xf32, #tpu.memory_space<vmem>>, vector<128x8xf32>,
    return
  }
  func.func @transform_0(%arg0: i32) -> (i32, i32) {
    %c0_i32 = arith.constant 0 : i32
    %c0_i32_0 = arith.constant 0 : i32
    return %arg0, %c0_i32 : i32, i32
  }
  func.func @transform_1(%arg0: i32) -> (i32, i32) {
    %c0_i32 = arith.constant 0 : i32
    %c0_i32_0 = arith.constant 0 : i32
    %c0_i32_1 = arith.constant 0 : i32
    return %c0_i32, %c0_i32_0 : i32, i32
  }
  func.func @transform_2(%arg0: i32) -> (i32, i32) {
    %c0_i32 = arith.constant 0 : i32
    %c0_i32_0 = arith.constant 0 : i32
    %c0_i32_1 = arith.constant 0 : i32
    return %c0_i32, %c0_i32_0 : i32, i32
  }
  func.func @transform_3(%arg0: i32) -> (i32, i32) {
    %c0_i32 = arith.constant 0 : i32
    %c0_i32_0 = arith.constant 0 : i32
    %c0_i32_1 = arith.constant 0 : i32
    return %c0_i32, %c0_i32_0 : i32, i32
  }
  func.func @transform_4(%arg0: i32) -> (i32, i32) {
    %c0_i32 = arith.constant 0 : i32
    %c0_i32_0 = arith.constant 0 : i32
    return %arg0, %c0_i32 : i32, i32
  }
  func.func @transform_5(%arg0: i32) -> (i32, i32) {
    %c0_i32 = arith.constant 0 : i32
    %c0_i32_0 = arith.constant 0 : i32
    return %arg0, %c0_i32 : i32, i32
  }
  func.func @transform_6(%arg0: i32) -> (i32, i32) {
    %c0_i32 = arith.constant 0 : i32
    %c0_i32_0 = arith.constant 0 : i32
    return %arg0, %c0_i32 : i32, i32
  }
}

</mosaic_0001>

<bundles_post_ra>
// kernel: tpu_custom_call.1
= control target key start
LH: loop header
LB: loop body
LE: loop exit
PB: predicated region body
PF: predicated region fallthrough
CT: control target
= control target key end

     0   :  { %s877_s21 = smov 0   ;;  %s1154_s0 = inlined_call_operand.vmem [shape: f32[256,128], index: 0, kind: input, shape index: {}]   ;;  %s1155_s1 = inlined_call_operand.vmem [shape: f32[128,64], index: 1, kind: input, shape index: {}]   ;;  %s1156_s2 = inlined_call_operand.vmem [shape: f32[64,8], index: 2, kind: input, shape index: {}]   ;;  %s1157_s3 = inlined_call_operand.vmem [shape: f32[64,8], index: 3, kind: input, shape index: {}]   ;;  %s1158_s4 = inlined_call_operand.vmem [shape: f32[256,64], index: 4, kind: output, shape index: {0}]   ;;  %s1159_s5 = inlined_call_operand.vmem [shape: f32[256,8], index: 5, kind: output, shape index: {1}]   ;;  %s1160_s6 = inlined_call_operand.vmem [shape: f32[256,8], index: 6, kind: output, shape index: {2}]  }
   0x1 LB: > { %s747_s22 = sadd.s32 4294967295, %s840_s21   ;;  %p751_p0 = scmp.ge.s32.totalorder %s840_s21, 1  ;;  %s840_s21 = sphi %s877_s21, %s17_s21  }
   0x2   : > { %p218_p1 = scmp.lt.s32.totalorder %s840_s21, 3 }
   0x4   : > { %p219_p2 = pnand %p751_p0, %p218_p1 }
   0x5   : > { %s752_s15 = sshll.u32 (!%p219_p2), %s747_s22, 4 }
   0x6   : > { %222 = sbr.rel (%p219_p2) target bundleno = 398 (0x18e), region = 36  ;;  %p259_p3 = scmp.lt.s32.totalorder (!%p219_p2), %s752_s15, 31 }
   0xb   : > { %v313_v0 = vld [vmem:[%s1155_s1 + $0x78] sm:$0xff]  ;;  %v312_v1 = vld [vmem:[%s1155_s1 + $0x70] sm:$0xff]  ;;  %v311_v2 = vld [vmem:[%s1155_s1 + $0x68] sm:$0xff]  ;;  %s1162_s15 = smov (!%p259_p3, %s752_s15), 31  ;;  %vm379_vm0 = vcmask 523264   ;;  %vm517_vm1 = vcmask 64512  }
   0xc   : > { %314 = vmatpush.msra.mxu0 %v313_v0  ;;  %794 = vmatpush.msra.mxu3 %v313_v0  ;;  %v310_v3 = vld [vmem:[%s1155_s1 + $0x60] sm:$0xff]  ;;  %v309_v4 = vld [vmem:[%s1155_s1 + $0x58] sm:$0xff]  ;;  %v308_v5 = vld [vmem:[%s1155_s1 + $0x50] sm:$0xff]  ;;  %s924_s27 = sshll.u32 %s1162_s15, 3 }
   0xd   : > { %v307_v6 = vld [vmem:[%s1155_s1 + $0x48] sm:$0xff]  ;;  %v306_v7 = vld [vmem:[%s1155_s1 + $0x40] sm:$0xff]  ;;  %v305_v8 = vld [vmem:[%s1155_s1 + $0x38] sm:$0xff]  ;;  %s936_s10 = scalar_lea.vmem %s1154_s0, %s924_s27  ;;  %s1009_s26 = scalar_lea.vmem %s1158_s4, %s924_s27 }
   0xe   : > { %315 = vmatpush.msra.mxu0 %v312_v1  ;;  %795 = vmatpush.msra.mxu3 %v312_v1  ;;  %v304_v9 = vld [vmem:[%s1155_s1 + $0x30] sm:$0xff]  ;;  %v303_v10 = vld [vmem:[%s1155_s1 + $0x28] sm:$0xff]  ;;  %v302_v11 = vld [vmem:[%s1155_s1 + $0x20] sm:$0xff]  ;;  %s1079_s30 = scalar_lea.vmem %s1159_s5, %s924_s27  ;;  %s1087_s9 = scalar_lea.vmem %s1160_s6, %s924_s27 }
   0xf   : > { %v301_v12 = vld [vmem:[%s1155_s1 + $0x18] sm:$0xff]  ;;  %v300_v13 = vld [vmem:[%s1155_s1 + $0x10] sm:$0xff]  ;;  %v299_v14 = vld [vmem:[%s1155_s1 + $0x8] sm:$0xff] }
  0x10   : > { %316 = vmatpush.msra.mxu0 %v311_v2  ;;  %796 = vmatpush.msra.mxu3 %v311_v2  ;;  %v298_v15 = vld [vmem:[%s1155_s1] sm:$0xff]  ;;  %v293_v17 = vld [vmem:[%s936_s10 + $0x58] sm:$0xff]  ;;  %v283_v18 = vld [vmem:[%s936_s10 + $0x8] sm:$0xff] }
  0x11   : > { %v282_v16 = vld [vmem:[%s936_s10] sm:$0xff]  ;;  %v284_v20 = vld [vmem:[%s936_s10 + $0x10] sm:$0xff]  ;;  %v295_v21 = vld [vmem:[%s936_s10 + $0x68] sm:$0xff] }
  0x12   : > { %317 = vmatpush.msra.mxu0 %v310_v3  ;;  %797 = vmatpush.msra.mxu3 %v310_v3  ;;  %v294_v19 = vld [vmem:[%s936_s10 + $0x60] sm:$0xff]  ;;  %v285_v22 = vld [vmem:[%s936_s10 + $0x18] sm:$0xff]  ;;  %v296_v23 = vld [vmem:[%s936_s10 + $0x70] sm:$0xff] }
  0x13   : > { %v286_v24 = vld [vmem:[%s936_s10 + $0x20] sm:$0xff]  ;;  %v297_v25 = vld [vmem:[%s936_s10 + $0x78] sm:$0xff]  ;;  %v287_v26 = vld [vmem:[%s936_s10 + $0x28] sm:$0xff] }
  0x14   : > { %318 = vmatpush.msra.mxu0 %v309_v4  ;;  %798 = vmatpush.msra.mxu3 %v309_v4  ;;  %v288_v27 = vld [vmem:[%s936_s10 + $0x30] sm:$0xff]  ;;  %v403_v28 = vld [vmem:[%s1156_s2 + $0x38] sm:$0xff]  ;;  %v401_v32 = vld [vmem:[%s1156_s2 + $0x28] sm:$0xff] }
  0x15   : > { %v541_v29 = vld [vmem:[%s1157_s3 + $0x38] sm:$0xff]  ;;  %v402_v30 = vld [vmem:[%s1156_s2 + $0x30] sm:$0xff]  ;;  %460 = vmatpush.msra.mxu1 %v403_v28  ;;  %v539_v33 = vld [vmem:[%s1157_s3 + $0x28] sm:$0xff] }
  0x16   : > { %319 = vmatpush.msra.mxu0 %v308_v5  ;;  %799 = vmatpush.msra.mxu3 %v308_v5  ;;  %v540_v31 = vld [vmem:[%s1157_s3 + $0x30] sm:$0xff]  ;;  %v400_v34 = vld [vmem:[%s1156_s2 + $0x20] sm:$0xff]  ;;  %v289_v36 = vld [vmem:[%s936_s10 + $0x38] sm:$0xff] }
  0x17   : > { %550 = vmatpush.msra.mxu2 %v541_v29  ;;  %461 = vmatpush.msra.mxu1 %v402_v30  ;;  %v538_v35 = vld [vmem:[%s1157_s3 + $0x20] sm:$0xff]  ;;  %v399_v37 = vld [vmem:[%s1156_s2 + $0x18] sm:$0xff]  ;;  %v398_v39 = vld [vmem:[%s1156_s2 + $0x10] sm:$0xff] }
  0x18   : > { %320 = vmatpush.msra.mxu0 %v307_v6  ;;  %800 = vmatpush.msra.mxu3 %v307_v6  ;;  %v537_v38 = vld [vmem:[%s1157_s3 + $0x18] sm:$0xff]  ;;  %v536_v40 = vld [vmem:[%s1157_s3 + $0x10] sm:$0xff]  ;;  %v397_v41 = vld [vmem:[%s1156_s2 + $0x8] sm:$0xff] }
  0x19   : > { %551 = vmatpush.msra.mxu2 %v540_v31  ;;  %462 = vmatpush.msra.mxu1 %v401_v32  ;;  %v535_v42 = vld [vmem:[%s1157_s3 + $0x8] sm:$0xff]  ;;  %v290_v43 = vld [vmem:[%s936_s10 + $0x40] sm:$0xff]  ;;  %v292_v45 = vld [vmem:[%s936_s10 + $0x50] sm:$0xff] }
  0x1a   : > { %321 = vmatpush.msra.mxu0 %v306_v7  ;;  %801 = vmatpush.msra.mxu3 %v306_v7  ;;  %v291_v44 = vld [vmem:[%s936_s10 + $0x48] sm:$0xff]  ;;  %v396_v46 = vld [vmem:[%s1156_s2] sm:$0xff] }
  0x1b   : > { %552 = vmatpush.msra.mxu2 %v539_v33  ;;  %463 = vmatpush.msra.mxu1 %v400_v34  ;;  %v534_v47 = vld [vmem:[%s1157_s3] sm:$0xff] }
  0x1c   : > { %322 = vmatpush.msra.mxu0 %v305_v8  ;;  %802 = vmatpush.msra.mxu3 %v305_v8 }
  0x1d   : > { %553 = vmatpush.msra.mxu2 %v538_v35  ;;  %464 = vmatpush.msra.mxu1 %v399_v37 }
  0x1e   : > { %323 = vmatpush.msra.mxu0 %v304_v9  ;;  %803 = vmatpush.msra.mxu3 %v304_v9 }
  0x1f   : > { %554 = vmatpush.msra.mxu2 %v537_v38  ;;  %465 = vmatpush.msra.mxu1 %v398_v39 }
  0x20   : > { %324 = vmatpush.msra.mxu0 %v303_v10  ;;  %804 = vmatpush.msra.mxu3 %v303_v10 }
  0x21   : > { %555 = vmatpush.msra.mxu2 %v536_v40  ;;  %466 = vmatpush.msra.mxu1 %v397_v41 }
  0x22   : > { %325 = vmatpush.msra.mxu0 %v302_v11  ;;  %805 = vmatpush.msra.mxu3 %v302_v11 }
  0x23   : > { %556 = vmatpush.msra.mxu2 %v535_v42  ;;  %467 = vmatpush.msra.mxu1 %v396_v46 }
  0x24   : > { %326 = vmatpush.msra.mxu0 %v301_v12  ;;  %806 = vmatpush.msra.mxu3 %v301_v12 }
  0x25   : > { %557 = vmatpush.msra.mxu2 %v534_v47 }
  0x26   : > { %327 = vmatpush.msra.mxu0 %v300_v13  ;;  %807 = vmatpush.msra.mxu3 %v300_v13 }
  0x28   : > { %328 = vmatpush.msra.mxu0 %v299_v14  ;;  %808 = vmatpush.msra.mxu3 %v299_v14 }
  0x2a   : > { %329 = vmatpush.msra.mxu0 %v298_v15  ;;  %809 = vmatpush.msra.mxu3 %v298_v15 }
  0x2b   : > { %330 = vmatmul.f32.vlgmr.msra.gmra.mxu0 %v282_v16  ;;  %363 = vmatmul.f32.vlgmr.msra.gmra.mxu3 %v293_v17 }
  0x2c   : > { %810 = vmatpush.msrb.mxu3 %v403_v28 }
  0x2e   : > { %811 = vmatpush.msrb.mxu3 %v402_v30 }
  0x30   : > { %812 = vmatpush.msrb.mxu3 %v401_v32 }
  0x32   : > { %813 = vmatpush.msrb.mxu3 %v400_v34 }
  0x33   : > { %333 = vmatmul.f32.gmra.mxu0 %v283_v18  ;;  %366 = vmatmul.f32.gmra.mxu3 %v294_v19 }
  0x34   : > { %814 = vmatpush.msrb.mxu3 %v399_v37 }
  0x36   : > { %815 = vmatpush.msrb.mxu3 %v398_v39 }
  0x38   : > { %816 = vmatpush.msrb.mxu3 %v397_v41 }
  0x3a   : > { %817 = vmatpush.msrb.mxu3 %v396_v46 }
  0x3b   : > { %336 = vmatmul.f32.gmra.mxu0 %v284_v20  ;;  %369 = vmatmul.f32.gmra.mxu3 %v295_v21 }
  0x3c   : > { %818 = vmatpush.msra.mxu3 %v541_v29 }
  0x3e   : > { %819 = vmatpush.msra.mxu3 %v540_v31 }
  0x40   : > { %820 = vmatpush.msra.mxu3 %v539_v33 }
  0x42   : > { %821 = vmatpush.msra.mxu3 %v538_v35 }
  0x43   : > { %339 = vmatmul.f32.gmra.mxu0 %v285_v22  ;;  %372 = vmatmul.f32.gmra.mxu3 %v296_v23 }
  0x44   : > { %822 = vmatpush.msra.mxu3 %v537_v38 }
  0x46   : > { %823 = vmatpush.msra.mxu3 %v536_v40 }
  0x48   : > { %824 = vmatpush.msra.mxu3 %v535_v42 }
  0x4a   : > { %825 = vmatpush.msra.mxu3 %v534_v47 }
  0x4b   : > { %342 = vmatmul.f32.gmra.mxu0 %v286_v24  ;;  %375 = vmatmul.f32.gmra.mxu3 %v297_v25 }
  0x53   : > { %345 = vmatmul.f32.gmra.mxu0 %v287_v26 }
  0x5b   : > { %348 = vmatmul.f32.gmra.mxu0 %v288_v27 }
  0x63   : > { %351 = vmatmul.f32.gmra.mxu0 %v289_v36 }
  0x6b   : > { %354 = vmatmul.f32.gmra.mxu0 %v290_v43 }
  0x73   : > { %357 = vmatmul.f32.gmra.mxu0 %v291_v44 }
  0x7b   : > { %360 = vmatmul.f32.gmra.mxu0 %v292_v45 }
  0xa8   : > { %v331_v48 = vpop.f32.mrf.mxu0 }
  0xa9   : > { %380 = vst.msk [vmem:[%s1009_s26] sm:$0xff] %vm379_vm0, %v331_v48  ;;  %760 = vmatmul.msk.f32.vlgmr.msra.gmra.mxu1 %vm379_vm0, %v331_v48  ;;  %776 = vmatmul.msk.f32.vlgmr.msra.gmra.mxu2 %vm379_vm0, %v331_v48 }
  0xae   : > { %v364_v49 = vpop.f32.mrf.mxu3 }
  0xaf   : > { %391 = vst.msk [vmem:[%s1009_s26 + $0x58] sm:$0xff] %vm379_vm0, %v364_v49 }
  0xb0   : > { %v334_v50 = vpop.f32.mrf.mxu0 }
  0xb1   : > { %381 = vst.msk [vmem:[%s1009_s26 + $0x8] sm:$0xff] %vm379_vm0, %v334_v50  ;;  %761 = vmatmul.msk.f32.gmra.mxu1 %vm379_vm0, %v334_v50  ;;  %777 = vmatmul.msk.f32.gmra.mxu2 %vm379_vm0, %v334_v50 }
  0xb6   : > { %v367_v51 = vpop.f32.mrf.mxu3 }
  0xb7   : > { %392 = vst.msk [vmem:[%s1009_s26 + $0x60] sm:$0xff] %vm379_vm0, %v367_v51 }
  0xb8   : > { %v337_v52 = vpop.f32.mrf.mxu0 }
  0xb9   : > { %382 = vst.msk [vmem:[%s1009_s26 + $0x10] sm:$0xff] %vm379_vm0, %v337_v52  ;;  %762 = vmatmul.msk.f32.gmra.mxu1 %vm379_vm0, %v337_v52  ;;  %778 = vmatmul.msk.f32.gmra.mxu2 %vm379_vm0, %v337_v52 }
  0xbe   : > { %v370_v53 = vpop.f32.mrf.mxu3 }
  0xbf   : > { %393 = vst.msk [vmem:[%s1009_s26 + $0x68] sm:$0xff] %vm379_vm0, %v370_v53  ;;  %773 = vmatmul.msk.f32.vlgmr.msrb.gmra.mxu3 %vm379_vm0, %v370_v53 }
  0xc0   : > { %v340_v54 = vpop.f32.mrf.mxu0 }
  0xc1   : > { %383 = vst.msk [vmem:[%s1009_s26 + $0x18] sm:$0xff] %vm379_vm0, %v340_v54  ;;  %763 = vmatmul.msk.f32.gmra.mxu1 %vm379_vm0, %v340_v54  ;;  %779 = vmatmul.msk.f32.gmra.mxu2 %vm379_vm0, %v340_v54 }
  0xc6   : > { %v373_v55 = vpop.f32.mrf.mxu3 }
  0xc7   : > { %394 = vst.msk [vmem:[%s1009_s26 + $0x70] sm:$0xff] %vm379_vm0, %v373_v55  ;;  %774 = vmatmul.msk.f32.gmra.mxu3 %vm379_vm0, %v373_v55 }
  0xc8   : > { %v343_v56 = vpop.f32.mrf.mxu0 }
  0xc9   : > { %384 = vst.msk [vmem:[%s1009_s26 + $0x20] sm:$0xff] %vm379_vm0, %v343_v56  ;;  %764 = vmatmul.msk.f32.gmra.mxu1 %vm379_vm0, %v343_v56  ;;  %780 = vmatmul.msk.f32.gmra.mxu2 %vm379_vm0, %v343_v56 }
  0xce   : > { %v376_v57 = vpop.f32.mrf.mxu3 }
  0xcf   : > { %395 = vst.msk [vmem:[%s1009_s26 + $0x78] sm:$0xff] %vm379_vm0, %v376_v57  ;;  %775 = vmatmul.msk.f32.gmra.mxu3 %vm379_vm0, %v376_v57 }
  0xd0   : > { %v346_v58 = vpop.f32.mrf.mxu0 }
  0xd1   : > { %385 = vst.msk [vmem:[%s1009_s26 + $0x28] sm:$0xff] %vm379_vm0, %v346_v58  ;;  %765 = vmatmul.msk.f32.gmra.mxu1 %vm379_vm0, %v346_v58  ;;  %781 = vmatmul.msk.f32.gmra.mxu2 %vm379_vm0, %v346_v58 }
  0xd7   : > { %789 = vmatmul.msk.f32.vlgmr.msra.gmra.mxu3 %vm379_vm0, %v370_v53 }
  0xd8   : > { %v349_v59 = vpop.f32.mrf.mxu0 }
  0xd9   : > { %386 = vst.msk [vmem:[%s1009_s26 + $0x30] sm:$0xff] %vm379_vm0, %v349_v59  ;;  %766 = vmatmul.msk.f32.gmra.mxu1 %vm379_vm0, %v349_v59  ;;  %782 = vmatmul.msk.f32.gmra.mxu2 %vm379_vm0, %v349_v59 }
  0xdf   : > { %790 = vmatmul.msk.f32.gmra.mxu3 %vm379_vm0, %v373_v55 }
  0xe0   : > { %v352_v60 = vpop.f32.mrf.mxu0 }
  0xe1   : > { %387 = vst.msk [vmem:[%s1009_s26 + $0x38] sm:$0xff] %vm379_vm0, %v352_v60  ;;  %767 = vmatmul.msk.f32.gmra.mxu1 %vm379_vm0, %v352_v60  ;;  %783 = vmatmul.msk.f32.gmra.mxu2 %vm379_vm0, %v352_v60 }
  0xe7   : > { %791 = vmatmul.msk.f32.gmra.mxu3 %vm379_vm0, %v376_v57 }
  0xe8   : > { %v355_v61 = vpop.f32.mrf.mxu0 }
  0xe9   : > { %388 = vst.msk [vmem:[%s1009_s26 + $0x40] sm:$0xff] %vm379_vm0, %v355_v61  ;;  %768 = vmatmul.msk.f32.gmra.mxu1 %vm379_vm0, %v355_v61  ;;  %784 = vmatmul.msk.f32.gmra.mxu2 %vm379_vm0, %v355_v61 }
  0xf0   : > { %v358_v62 = vpop.f32.mrf.mxu0 }
  0xf1   : > { %389 = vst.msk [vmem:[%s1009_s26 + $0x48] sm:$0xff] %vm379_vm0, %v358_v62  ;;  %769 = vmatmul.msk.f32.gmra.mxu1 %vm379_vm0, %v358_v62  ;;  %785 = vmatmul.msk.f32.gmra.mxu2 %vm379_vm0, %v358_v62 }
  0xf8   : > { %v361_v63 = vpop.f32.mrf.mxu0 }
  0xf9   : > { %390 = vst.msk [vmem:[%s1009_s26 + $0x50] sm:$0xff] %vm379_vm0, %v361_v63  ;;  %770 = vmatmul.msk.f32.gmra.mxu1 %vm379_vm0, %v361_v63  ;;  %786 = vmatmul.msk.f32.gmra.mxu2 %vm379_vm0, %v361_v63 }
 0x101   : > { %771 = vmatmul.msk.f32.gmra.mxu1 %vm379_vm0, %v364_v49  ;;  %787 = vmatmul.msk.f32.gmra.mxu2 %vm379_vm0, %v364_v49 }
 0x109   : > { %772 = vmatmul.msk.f32.gmra.mxu1 %vm379_vm0, %v367_v51  ;;  %788 = vmatmul.msk.f32.gmra.mxu2 %vm379_vm0, %v367_v51 }
 0x126   : > { %v469_v0 = vpop.f32.mrf.mxu1 }
 0x127   : > { %518 = vst.msk [vmem:[%s1079_s30] sm:$0xff] %vm517_vm1, %v469_v0 }
 0x12c   : > { %v559_v1 = vpop.f32.mrf.mxu2 }
 0x12d   : > { %607 = vst.msk [vmem:[%s1087_s9] sm:$0xff] %vm517_vm1, %v559_v1 }
 0x12e   : > { %v472_v2 = vpop.f32.mrf.mxu1 }
 0x12f   : > { %519 = vst.msk [vmem:[%s1079_s30 + $0x8] sm:$0xff] %vm517_vm1, %v472_v2 }
 0x134   : > { %v562_v3 = vpop.f32.mrf.mxu2 }
 0x135   : > { %608 = vst.msk [vmem:[%s1087_s9 + $0x8] sm:$0xff] %vm517_vm1, %v562_v3 }
 0x136   : > { %v475_v4 = vpop.f32.mrf.mxu1 }
 0x137   : > { %520 = vst.msk [vmem:[%s1079_s30 + $0x10] sm:$0xff] %vm517_vm1, %v475_v4 }
 0x13c   : > { %v565_v5 = vpop.f32.mrf.mxu2 }
 0x13d   : > { %609 = vst.msk [vmem:[%s1087_s9 + $0x10] sm:$0xff] %vm517_vm1, %v565_v5 }
 0x13e   : > { %v478_v6 = vpop.f32.mrf.mxu1 }
 0x13f   : > { %521 = vst.msk [vmem:[%s1079_s30 + $0x18] sm:$0xff] %vm517_vm1, %v478_v6 }
 0x142   : > { %v508_v7 = vpop.f32.mrf.mxu3 }
 0x143   : > { %531 = vst.msk [vmem:[%s1079_s30 + $0x68] sm:$0xff] %vm517_vm1, %v508_v7 }
 0x144   : > { %v568_v8 = vpop.f32.mrf.mxu2 }
 0x145   : > { %610 = vst.msk [vmem:[%s1087_s9 + $0x18] sm:$0xff] %vm517_vm1, %v568_v8 }
 0x146   : > { %v481_v9 = vpop.f32.mrf.mxu1 }
 0x147   : > { %522 = vst.msk [vmem:[%s1079_s30 + $0x20] sm:$0xff] %vm517_vm1, %v481_v9 }
 0x14a   : > { %v511_v10 = vpop.f32.mrf.mxu3 }
 0x14b   : > { %532 = vst.msk [vmem:[%s1079_s30 + $0x70] sm:$0xff] %vm517_vm1, %v511_v10 }
 0x14c   : > { %v571_v11 = vpop.f32.mrf.mxu2 }
 0x14d   : > { %611 = vst.msk [vmem:[%s1087_s9 + $0x20] sm:$0xff] %vm517_vm1, %v571_v11 }
 0x14e   : > { %v484_v12 = vpop.f32.mrf.mxu1 }
 0x14f   : > { %523 = vst.msk [vmem:[%s1079_s30 + $0x28] sm:$0xff] %vm517_vm1, %v484_v12 }
 0x152   : > { %v514_v13 = vpop.f32.mrf.mxu3 }
 0x153   : > { %533 = vst.msk [vmem:[%s1079_s30 + $0x78] sm:$0xff] %vm517_vm1, %v514_v13 }
 0x154   : > { %v574_v14 = vpop.f32.mrf.mxu2 }
 0x155   : > { %612 = vst.msk [vmem:[%s1087_s9 + $0x28] sm:$0xff] %vm517_vm1, %v574_v14 }
 0x156   : > { %v487_v15 = vpop.f32.mrf.mxu1 }
 0x157   : > { %524 = vst.msk [vmem:[%s1079_s30 + $0x30] sm:$0xff] %vm517_vm1, %v487_v15 }
 0x15a   : > { %v598_v16 = vpop.f32.mrf.mxu3 }
 0x15b   : > { %620 = vst.msk [vmem:[%s1087_s9 + $0x68] sm:$0xff] %vm517_vm1, %v598_v16 }
 0x15c   : > { %v577_v17 = vpop.f32.mrf.mxu2 }
 0x15d   : > { %613 = vst.msk [vmem:[%s1087_s9 + $0x30] sm:$0xff] %vm517_vm1, %v577_v17 }
 0x15e   : > { %v490_v18 = vpop.f32.mrf.mxu1 }
 0x15f   : > { %525 = vst.msk [vmem:[%s1079_s30 + $0x38] sm:$0xff] %vm517_vm1, %v490_v18 }
 0x162   : > { %v601_v19 = vpop.f32.mrf.mxu3 }
 0x163   : > { %621 = vst.msk [vmem:[%s1087_s9 + $0x70] sm:$0xff] %vm517_vm1, %v601_v19 }
 0x164   : > { %v580_v20 = vpop.f32.mrf.mxu2 }
 0x165   : > { %614 = vst.msk [vmem:[%s1087_s9 + $0x38] sm:$0xff] %vm517_vm1, %v580_v20 }
 0x166   : > { %v493_v21 = vpop.f32.mrf.mxu1 }
 0x167   : > { %526 = vst.msk [vmem:[%s1079_s30 + $0x40] sm:$0xff] %vm517_vm1, %v493_v21 }
 0x16a   : > { %v604_v22 = vpop.f32.mrf.mxu3 }
 0x16b   : > { %622 = vst.msk [vmem:[%s1087_s9 + $0x78] sm:$0xff] %vm517_vm1, %v604_v22 }
 0x16c   : > { %v583_v23 = vpop.f32.mrf.mxu2 }
 0x16d   : > { %615 = vst.msk [vmem:[%s1087_s9 + $0x40] sm:$0xff] %vm517_vm1, %v583_v23 }
 0x16e   : > { %v496_v24 = vpop.f32.mrf.mxu1 }
 0x16f   : > { %527 = vst.msk [vmem:[%s1079_s30 + $0x48] sm:$0xff] %vm517_vm1, %v496_v24 }
 0x174   : > { %v586_v25 = vpop.f32.mrf.mxu2 }
 0x175   : > { %616 = vst.msk [vmem:[%s1087_s9 + $0x48] sm:$0xff] %vm517_vm1, %v586_v25 }
 0x176   : > { %v499_v26 = vpop.f32.mrf.mxu1 }
 0x177   : > { %528 = vst.msk [vmem:[%s1079_s30 + $0x50] sm:$0xff] %vm517_vm1, %v499_v26 }
 0x17c   : > { %v589_v27 = vpop.f32.mrf.mxu2 }
 0x17d   : > { %617 = vst.msk [vmem:[%s1087_s9 + $0x50] sm:$0xff] %vm517_vm1, %v589_v27 }
 0x17e   : > { %v502_v28 = vpop.f32.mrf.mxu1 }
 0x17f   : > { %529 = vst.msk [vmem:[%s1079_s30 + $0x58] sm:$0xff] %vm517_vm1, %v502_v28 }
 0x184   : > { %v592_v29 = vpop.f32.mrf.mxu2 }
 0x185   : > { %618 = vst.msk [vmem:[%s1087_s9 + $0x58] sm:$0xff] %vm517_vm1, %v592_v29 }
 0x186   : > { %v505_v30 = vpop.f32.mrf.mxu1 }
 0x187   : > { %530 = vst.msk [vmem:[%s1079_s30 + $0x60] sm:$0xff] %vm517_vm1, %v505_v30 }
 0x18c   : > { %v595_v31 = vpop.f32.mrf.mxu2 }
 0x18d   : > { %619 = vst.msk [vmem:[%s1087_s9 + $0x60] sm:$0xff] %vm517_vm1, %v595_v31 }
 0x18e PF: > { %s17_s21 = sadd.s32 1, %s840_s21  }
 0x18f   : > { %p14_p4 = scmp.ge.s32.totalorder %s17_s21, 4  }
 0x191   :  { %16 = sbr.rel (!%p14_p4) target bundleno = 1 (0x1), region = 90 }

</bundles_post_ra>
